<compile_context>
chip_gen: v5e
topology: v5e:2x2
jax: 0.10.0
libtpu: 0.0.40
codegen_flags: <defaults>
</compile_context>

<pallas_src>
import functools

import jax
import jax.numpy as jnp
from jax.experimental import pallas as pl
from jax.experimental.pallas import tpu as pltpu

NUM_CLASSES = 3
CLASS_PAD = 128          # lane-dense padded class dimension
_NEG_BIG = -1e30         # effectively -inf for padded classes (avoids inf arithmetic)


def _round_up(n, m):
    return ((n + m - 1) // m) * m


def _pick_tile_b(batch, feat):
    """Batch tile: multiple of 8, <= 512, double-buffered x tile <= ~8 MiB (v7x-safe)."""
    b8 = _round_up(batch, 8)
    cap = max(8, ((8 << 20) // (2 * feat * 4)) // 8 * 8)
    return min(512, b8, cap)


def _probs_kernel(x_ref, w_ref, mb_ref, probs_ref):
    # logits over the padded class dim; mb holds the real bias for c < NUM_CLASSES
    # and -1e30 for padded lanes, which kills them in the softmax.
    logits = jnp.dot(x_ref[...], w_ref[...], preferred_element_type=jnp.float32)
    logits = logits + mb_ref[...]                      # (tb, CLASS_PAD)
    m = jnp.max(logits, axis=1, keepdims=True)
    e = jnp.exp(logits - m)
    denom = jnp.sum(e, axis=1, keepdims=True)
    probs_ref[...] = (e * pl.reciprocal(denom, approx=False)).astype(probs_ref.dtype)


def _fused_loss_kernel(x_ref, w_ref, mb_ref, y_ref, loss_ref, *,
                       num_classes, true_b, tile_b):
    pid = pl.program_id(0)

    @pl.when(pid == 0)
    def _init():
        loss_ref[...] = jnp.zeros_like(loss_ref)

    # logits -> softmax (kept entirely in registers/VMEM; never written to HBM)
    logits = jnp.dot(x_ref[...], w_ref[...], preferred_element_type=jnp.float32)
    logits = logits + mb_ref[...]
    m = jnp.max(logits, axis=1, keepdims=True)
    e = jnp.exp(logits - m)
    p = e * pl.reciprocal(jnp.sum(e, axis=1, keepdims=True), approx=False)  # padded classes -> 0

    cls = jax.lax.broadcasted_iota(jnp.int32, p.shape, 1)
    # CE applied to the probabilities (as the torch module does).  probs are in
    # [0,1] so no max-shift is needed; restrict the logsumexp to real classes.
    lse = jnp.log(jnp.sum(jnp.where(cls < num_classes, jnp.exp(p), 0.0),
                          axis=1, keepdims=True))
    picked = jnp.sum(jnp.where(cls == y_ref[...], p, 0.0), axis=1, keepdims=True)
    per_sample = lse - picked                                               # (tb, 1)

    # Mask padded batch rows; the mean divides by the true global batch size.
    row = pid * tile_b + jax.lax.broadcasted_iota(jnp.int32, per_sample.shape, 0)
    per_sample = jnp.where(row < true_b, per_sample, 0.0)
    loss_ref[...] += jnp.sum(per_sample, keepdims=True)                     # (1, 1)

    @pl.when(pid == pl.num_programs(0) - 1)
    def _finalize():
        loss_ref[...] = loss_ref[...] / float(true_b)


def linear_softmax_probs(x, w_pad, mb):
    B, D = x.shape
    cpad = w_pad.shape[1]
    tb = _pick_tile_b(B, D)
    bp = _round_up(B, tb)
    if bp != B:
        x = jnp.pad(x, ((0, bp - B), (0, 0)))
    out = pl.pallas_call(
        _probs_kernel,
        out_shape=jax.ShapeDtypeStruct((bp, cpad), jnp.float32),
        grid=(bp // tb,),
        in_specs=[
            pl.BlockSpec((tb, D), lambda i: (i, 0)),
            pl.BlockSpec((D, cpad), lambda i: (0, 0)),
            pl.BlockSpec((1, cpad), lambda i: (0, 0)),
        ],
        out_specs=pl.BlockSpec((tb, cpad), lambda i: (i, 0)),
        compiler_params=pltpu.CompilerParams(dimension_semantics=("parallel",)),
    )(x, w_pad, mb)
    return out[:B, :NUM_CLASSES]


def fused_cross_entropy_loss(x, w_pad, mb, y):
    B, D = x.shape
    cpad = w_pad.shape[1]
    tb = _pick_tile_b(B, D)
    bp = _round_up(B, tb)
    if bp != B:
        x = jnp.pad(x, ((0, bp - B), (0, 0)))
        y = jnp.pad(y, (0, bp - B))
    y2 = y.reshape(bp, 1).astype(jnp.int32)
    kernel = functools.partial(_fused_loss_kernel,
                               num_classes=NUM_CLASSES, true_b=B, tile_b=tb)
    loss = pl.pallas_call(
        kernel,
        out_shape=jax.ShapeDtypeStruct((1, 1), jnp.float32),
        grid=(bp // tb,),
        in_specs=[
            pl.BlockSpec((tb, D), lambda i: (i, 0)),
            pl.BlockSpec((D, cpad), lambda i: (0, 0)),
            pl.BlockSpec((1, cpad), lambda i: (0, 0)),
            pl.BlockSpec((tb, 1), lambda i: (i, 0)),
        ],
        out_specs=pl.BlockSpec((1, 1), lambda i: (0, 0)),
        compiler_params=pltpu.CompilerParams(dimension_semantics=("arbitrary",)),
    )(x, w_pad, mb, y2)
    return loss[0, 0]


class MyCossEntropyPallas:
    """JAX/Pallas port of the PyTorch MyCossEntropy module."""

    def __init__(self, input_size, key):
        k_w, k_b = jax.random.split(key)
        bound = 1.0 / float(input_size) ** 0.5
        # Stored as [D, C] (transpose of torch's [C, D]) so the kernel does x @ W.
        self.W = jax.random.uniform(
            k_w, (input_size, NUM_CLASSES), jnp.float32, -bound, bound)
        self.b = jax.random.uniform(k_b, (NUM_CLASSES,), jnp.float32, -bound, bound)
        # Precomputed lane-dense padded parameters (built once, not per call):
        # zero weight columns for padded classes; bias row carries -1e30 in
        # padded lanes so they vanish in the softmax.
        self.W_pad = (jnp.zeros((input_size, CLASS_PAD), jnp.float32)
                      .at[:, :NUM_CLASSES].set(self.W))
        self.mb = (jnp.full((1, CLASS_PAD), _NEG_BIG, jnp.float32)
                   .at[0, :NUM_CLASSES].set(self.b))

    def __call__(self, x, y=None):
        if y is not None:
            return fused_cross_entropy_loss(x, self.W_pad, self.mb, y)
        return linear_softmax_probs(x, self.W_pad, self.mb)


if __name__ == "__main__":
    key = jax.random.PRNGKey(0)
    k_params, k_x, k_y = jax.random.split(key, 3)

    B, D = 8, 32  # batch, input_size
    model = MyCossEntropyPallas(D, k_params)

    x = jax.random.normal(k_x, (B, D), dtype=jnp.float32)
    y = jax.random.randint(k_y, (B,), 0, NUM_CLASSES, dtype=jnp.int32)

    probs = model(x)      # forward(x)     -> (B, 3) softmax probabilities
    loss = model(x, y)    # forward(x, y)  -> scalar cross-entropy on probs
    jax.block_until_ready((probs, loss))

    # silent sanity check against a pure-JAX reference
    logits_ref = x @ model.W + model.b
    probs_ref = jax.nn.softmax(logits_ref, axis=1)
    loss_ref = jnp.mean(
        jax.nn.logsumexp(probs_ref, axis=1)
        - jnp.take_along_axis(probs_ref, y[:, None], axis=1)[:, 0]
    )
    assert jnp.allclose(probs, probs_ref, atol=1e-5), "probs mismatch"
    assert jnp.allclose(loss, loss_ref, atol=1e-5), "loss mismatch"

    print("KERNEL_OK")
</pallas_src>

<mosaic_0001>
module attributes {stable_mosaic.version = 11 : i64} {
  func.func @_probs_kernel(%arg0: i32, %arg1: memref<8x32xf32, #tpu.memory_space<vmem>>, %arg2: memref<32x128xf32, #tpu.memory_space<vmem>>, %arg3: memref<1x128xf32, #tpu.memory_space<vmem>>, %arg4: memref<8x128xf32, #tpu.memory_space<vmem>>) attributes {dimension_semantics = [#tpu.dimension_semantics<parallel>], iteration_bounds = array<i64: 1>, scalar_prefetch = 0 : i64, scratch_operands = 0 : i64, tpu.core_type = #tpu.core_type<tc>, window_params = [{transform_indices = @transform_0, window_bounds = array<i64: 8, 32>}, {pipeline_mode = #tpu.pipeline_mode<synchronous>, transform_indices = @transform_1, window_bounds = array<i64: 32, 128>}, {pipeline_mode = #tpu.pipeline_mode<synchronous>, transform_indices = @transform_2, window_bounds = array<i64: 1, 128>}, {transform_indices = @transform_3, window_bounds = array<i64: 8, 128>}]} {
    %c0 = arith.constant 0 : index
    %c0_0 = arith.constant 0 : index
    %0 = vector.load %arg1[%c0, %c0_0] : memref<8x32xf32, #tpu.memory_space<vmem>>, vector<8x32xf32>
    %c0_1 = arith.constant 0 : index
    %c0_2 = arith.constant 0 : index
    %1 = vector.load %arg2[%c0_1, %c0_2] : memref<32x128xf32, #tpu.memory_space<vmem>>, vector<32x128xf32>
    %cst = arith.constant dense<0.000000e+00> : vector<8x128xf32>
    %2 = tpu.matmul %0, %1, %cst {dimension_numbers = #tpu.dot_dimension_numbers<[1], [0], [0], [1], [0, 0, 1, 1], [], []>} : vector<8x32xf32>, vector<32x128xf32>, vector<8x128xf32> -> vector<8x128xf32>
    %c0_3 = arith.constant 0 : index
    %c0_4 = arith.constant 0 : index
    %3 = vector.load %arg3[%c0_3, %c0_4] : memref<1x128xf32, #tpu.memory_space<vmem>>, vector<1x128xf32>
    %4 = vector.broadcast %3 : vector<1x128xf32> to vector<8x128xf32>
    %5 = arith.addf %2, %4 : vector<8x128xf32>
    %cst_5 = arith.constant dense<0xFF800000> : vector<8xf32>
    %6 = vector.multi_reduction <maximumf>, %5, %cst_5 [1] : vector<8x128xf32> to vector<8xf32>
    %7 = vector.shape_cast %6 : vector<8xf32> to vector<8x1xf32>
    %8 = vector.broadcast %7 : vector<8x1xf32> to vector<8x128xf32>
    %9 = arith.subf %5, %8 : vector<8x128xf32>
    %10 = math.exp %9 : vector<8x128xf32>
    %cst_6 = arith.constant dense<0.000000e+00> : vector<8xf32>
    %11 = vector.multi_reduction <add>, %10, %cst_6 [1] : vector<8x128xf32> to vector<8xf32>
    %12 = vector.shape_cast %11 : vector<8xf32> to vector<8x1xf32>
    %13 = tpu.reciprocal %12 : vector<8x1xf32> -> vector<8x1xf32>
    %14 = vector.broadcast %13 : vector<8x1xf32> to vector<8x128xf32>
    %15 = arith.mulf %10, %14 : vector<8x128xf32>
    %c0_7 = arith.constant 0 : index
    %c0_8 = arith.constant 0 : index
    %16 = vector.load %arg4[%c0_7, %c0_8] : memref<8x128xf32, #tpu.memory_space<vmem>>, vector<8x128xf32>
    tpu.vector_store %arg4[%c0_7, %c0_8], %15 {strides = array<i32>} : memref<8x128xf32, #tpu.memory_space<vmem>>, vector<8x128xf32>,
    return
  }
  func.func @transform_0(%arg0: i32) -> (i32, i32) {
    %c0_i32 = arith.constant 0 : i32
    %c0_i32_0 = arith.constant 0 : i32
    return %arg0, %c0_i32 : i32, i32
  }
  func.func @transform_1(%arg0: i32) -> (i32, i32) {
    %c0_i32 = arith.constant 0 : i32
    %c0_i32_0 = arith.constant 0 : i32
    %c0_i32_1 = arith.constant 0 : i32
    return %c0_i32, %c0_i32_0 : i32, i32
  }
  func.func @transform_2(%arg0: i32) -> (i32, i32) {
    %c0_i32 = arith.constant 0 : i32
    %c0_i32_0 = arith.constant 0 : i32
    %c0_i32_1 = arith.constant 0 : i32
    return %c0_i32, %c0_i32_0 : i32, i32
  }
  func.func @transform_3(%arg0: i32) -> (i32, i32) {
    %c0_i32 = arith.constant 0 : i32
    %c0_i32_0 = arith.constant 0 : i32
    return %arg0, %c0_i32 : i32, i32
  }
}

</mosaic_0001>

<bundles_post_ra>
// kernel: tpu_custom_call.1
= control target key start
LH: loop header
LB: loop body
LE: loop exit
PB: predicated region body
PF: predicated region fallthrough
CT: control target
= control target key end

     0   :  { %8 = vsyncpa [#allocation3], 0  ;;  %s245_s0 = inlined_call_operand.hbm [shape: f32[8,32], index: 0, kind: input, shape index: {}]   ;;  %s246_s1 = inlined_call_operand.hbm [shape: f32[32,128], index: 1, kind: input, shape index: {}]   ;;  %s247_s2 = inlined_call_operand.vmem [shape: f32[1,128], index: 2, kind: input, shape index: {}]   ;;  %s248_s3 = inlined_call_operand.hbm [shape: f32[8,128], index: 3, kind: output, shape index: {}]  }
   0x1   :  { %9 = vsyncpa [#allocation6], 0 }
   0x2   :  { %10 = vsyncpa [#allocation4], 0  ;;  %s16_s14 = sshll.u32 %s245_s0, 4  ;;  %s208_s15 = smov [#allocation2]   ;;  %s17_s14 = int_to_ptr.hbm [resolvable:$true] %s16_s14 }
   0x3   :  { %s18_s16 = sshll.u32 %s208_s15, 4  ;;  %s26_s19 = sshll.u32 %s246_s1, 4  ;;  %s19_s16 = int_to_ptr.vmem [resolvable:$true] %s18_s16  ;;  %s27_s19 = int_to_ptr.hbm [resolvable:$true] %s26_s19 }
   0x4   :  { %21 = dma.hbm_to_vmem [thread:$0]  %s17_s14, 128, %s19_s16, [#allocation3]  }
   0x5   :  { %s209_s20 = smov [#allocation5]   ;;  %s210_s22 = smov 128  }
   0x6   :  { %s28_s21 = sshll.u32 %s209_s20, 4  ;;  %s211_s23 = smov 8   ;;  %s29_s21 = int_to_ptr.vmem [resolvable:$true] %s28_s21 }
   0x7   :  { %34 = dma.hbm_to_vmem [thread:$0]  %s27_s19, 512, %s29_s21, [#allocation6], %s210_s22, %s210_s22, %s211_s23  }
   0x8   :  { %202 = dma.done.wait [#allocation3], 128  }
   0x9   :  { %203 = vsyncadd [#allocation3], 4294967168 }
   0xa   :  { %204 = dma.done.wait [#allocation6], 512  }
   0xb   :  { %205 = vsyncadd [#allocation6], 4294966784  ;;  %v49_v0 = vld [vmem:[#allocation5 + $0x18] sm:$0xff]  ;;  %v48_v1 = vld [vmem:[#allocation5 + $0x10] sm:$0xff]  ;;  %vm54_vm0 = vcmask 261120   ;;  %s108_s27 = sshll.u32 %s248_s3, 4  ;;  %s109_s27 = int_to_ptr.hbm [resolvable:$true] %s108_s27 }
   0xc   :  { %70 = vmatpush.msra.mxu0 %v49_v0  ;;  %v47_v2 = vld [vmem:[#allocation5 + $0x8] sm:$0xff]  ;;  %v46_v3 = vld [vmem:[#allocation5] sm:$0xff]  ;;  %v45_v4 = vld [vmem:[#allocation2] sm:$0xff] }
   0xd   :  { %v125_v5 = vld [vmem:[%s247_s2] ss:$0 sm:$0xff]  ;;  %s212_s2 = smov [#allocation7]  }
   0xe   :  { %71 = vmatpush.msra.mxu0 %v48_v1  ;;  %s106_s24 = sshll.u32 %s212_s2, 4  ;;  %s107_s24 = int_to_ptr.vmem [resolvable:$true] %s106_s24 }
  0x10   :  { %72 = vmatpush.msra.mxu0 %v47_v2 }
  0x12   :  { %73 = vmatpush.msra.mxu0 %v46_v3 }
  0x13   :  { %119 = vmatmul.msk.f32.vlgmr.msra.gmra.mxu0 %vm54_vm0, %v45_v4 }
  0x90   :  { %v75_v6 = vpop.f32.mrf.mxu0 }
  0x91   :  { %v76_v7 = vadd.f32 %v125_v5, %v75_v6 }
  0x93   :  { %78 = vmax.xlane.f32.xlu0 %v76_v7 }
 0x106   :  { %v79_v8 = vpop.xlane.xlu0 %78 }
 0x107   :  { %v80_v9 = vsub.f32 %v76_v7, %v79_v8 }
 0x109   :  { %v81_v10 = vmul.f32 1.442695, %v80_v9 }
 0x10b   :  { %126 = vpow2.f32 %v81_v10 }
 0x111   :  { %v127_v11 = vpop.eup %126 }
 0x112   :  { %83 = vadd.xlane.f32.xlu0 %v127_v11 }
 0x185   :  { %v84_v12 = vpop.xlane.xlu0 %83 }
 0x186   :  { %128 = vrcp.f32 %v84_v12  ;;  %v96_v16 = vand.u32 2147483648, %v84_v12  ;;  %v94_v18 = vand.u32 2147483647, %v84_v12  ;;  %vm90_vm2 = vweird.f32 %v84_v12 }
 0x188   :  { %v97_v20 = vor.u32 1.1754944e-38, %v96_v16  ;;  %vm95_vm4 = vcmp.eq.f32.partialorder %v94_v18, 8.507059e+37 }
 0x18c   :  { %v129_v13 = vpop.eup %128 }
 0x18d   :  { %v86_v14 = vmul.f32 %v129_v13, %v84_v12  ;;  %vm91_vm1 = vweird.f32 %v129_v13 }
 0x18e   :  { %vm92_vm3 = vmor %vm90_vm2, %vm91_vm1 }
 0x18f   :  { %v87_v15 = vsub.f32 1.0, %v86_v14 }
 0x191   :  { %v88_v17 = vmul.f32 %v129_v13, %v87_v15 }
 0x193   :  { %v89_v19 = vadd.f32 %v129_v13, %v88_v17 }
 0x195   :  { %v93_v21 = vsel %vm92_vm3, %v129_v13, %v89_v19 }
 0x196   :  { %v98_v22 = vsel %vm95_vm4, %v97_v20, %v93_v21 }
 0x197   :  { %v99_v23 = vmul.f32 %v127_v11, %v98_v22 }
 0x199   :  { %100 = vst [vmem:[#allocation7] sm:$0xff] %v99_v23 }
 0x19a   :  { %111 = dma.vmem_to_hbm [thread:$0]  %s107_s24, 128, %s109_s27, [#allocation4]  }
 0x19b   :  { %206 = dma.done.wait [#allocation4], 128  }
 0x19c   :  { %207 = vsyncadd [#allocation4], 4294967168 }
 0x19d   :  { %116 = vsyncpa [#allocation3], 1 }
 0x19e   :  { %117 = vsyncpa [#allocation6], 1 }
 0x19f   :  { %118 = vsyncpa [#allocation4], 1 }

</bundles_post_ra>
